<compile_context>
chip_gen: v7x
topology: tpu7x:2x2x1
jax: 0.10.0
libtpu: 0.0.40
codegen_flags: <defaults>
</compile_context>

<pallas_src>
import functools

import jax
import jax.numpy as jnp
from jax import lax
from jax.experimental import pallas as pl
from jax.experimental.pallas import tpu as pltpu

EPS = 1e-5  # nn.BatchNorm2d default eps


def _round_up(x, m):
    return (x + m - 1) // m * m


def _vmem_budget_bytes():
    """Generation-aware VMEM budget: ~3/4 of capacity, capped at 96 MiB."""
    try:
        info = pltpu.get_tpu_info()
        cap = getattr(info, "vmem_capacity_bytes", None)
        if cap:
            return int(min(cap * 3 // 4, 96 * 1024 * 1024))
    except Exception:
        pass
    # Safe fallback: fits v7x's 64 MiB/TC; v5e/v6e have 128 MiB.
    return 48 * 1024 * 1024


def _pick_block_m(M, Kp, OCp, vmem_budget):
    """Largest 256-aligned block_m whose pass-1/pass-2 working sets fit VMEM."""
    # weight double-buffered (conservative; its index_map is constant):
    fixed = 4 * Kp * OCp + (2 << 20)  # + slack for stats scratch / semaphores
    # per-row bytes (conservative sum of pass-1 and pass-2 working sets):
    #   pass 1: 2x bf16 patch bufs (4*Kp) + 2x bf16 y out bufs (4*OCp)
    #   pass 2: 2x bf16 y in bufs (4*OCp) + 2x f32 out bufs (8*OCp)
    per_row = 4 * Kp + 16 * OCp
    avail = max(vmem_budget - fixed, per_row * 8)
    bm = avail // per_row
    bm = min(bm, 2048, _round_up(M, 256))
    if bm >= 256:
        bm = bm // 256 * 256
    else:
        bm = max(bm // 8 * 8, 8)
    return int(bm)


def _conv_stats_kernel(p_ref, w_ref, y_ref, stat_ref, acc_ref):
    """Pass 1: y_tile = P @ W (MXU, bf16 in / f32 acc), store bf16 y tile, and
    accumulate global per-channel sum / sum-of-squares into a VMEM scratch."""
    i = pl.program_id(0)

    @pl.when(i == 0)
    def _():
        acc_ref[...] = jnp.zeros_like(acc_ref)

    y = jnp.dot(p_ref[...], w_ref[...], preferred_element_type=jnp.float32)
    y_ref[...] = y.astype(y_ref.dtype)  # bf16 conv output for pass 2

    # Two row writes into the (8, OCp) scratch (no concatenate temporary).
    acc_ref[0:1, :] += jnp.sum(y, axis=0, keepdims=True)
    acc_ref[1:2, :] += jnp.sum(y * y, axis=0, keepdims=True)

    @pl.when(i == pl.num_programs(0) - 1)
    def _():
        stat_ref[...] = acc_ref[...]


def _bn_relu_kernel(y_ref, scale_ref, shift_ref, o_ref):
    """Pass 2: matmul-free. load bf16 y -> y*scale + shift -> ReLU -> store."""
    y = y_ref[...].astype(jnp.float32)
    o_ref[...] = jnp.maximum(y * scale_ref[...] + shift_ref[...], 0.0).astype(o_ref.dtype)


def bn_conv2d(x_nchw, weight, gamma, beta, *, stride=1, padding=1, block_m=None):
    """Forward of BN_Conv2d (bias=False, dilation=1, groups=1, activation=True)."""
    N, C, H, W = x_nchw.shape
    OC, IC, KH, KW = weight.shape
    assert IC == C
    OH = (H + 2 * padding - KH) // stride + 1
    OW = (W + 2 * padding - KW) // stride + 1

    # --- glue: NCHW -> NHWC in bf16, zero pad, im2col (tap order kh,kw,c) ---
    # TODO(synk): accept/return NHWC to drop the two full-activation transposes.
    x = jnp.transpose(x_nchw, (0, 2, 3, 1)).astype(jnp.bfloat16)
    x = jnp.pad(x, ((0, 0), (padding, padding), (padding, padding), (0, 0)))
    taps = []
    for kh in range(KH):
        for kw in range(KW):
            taps.append(x[:, kh:kh + OH * stride:stride, kw:kw + OW * stride:stride, :])
    patches = jnp.concatenate(taps, axis=-1).reshape(N * OH * OW, KH * KW * C)
    # TODO(synk): in-kernel im2col (memory_space=pl.ANY + manual overlapping-window
    # DMA) would remove the KH*KW HBM read amplification entirely (biggest on v5e).

    # PyTorch weight (OC, IC, KH, KW) -> (KH*KW*IC, OC) matching the patch order.
    w2d = jnp.transpose(weight, (2, 3, 1, 0)).reshape(KH * KW * IC, OC).astype(jnp.bfloat16)

    M, K = patches.shape

    # --- pad to lane/tile-friendly shapes (zero padding is numerically inert:
    # padded rows/cols contribute 0 to the matmul and to the stat sums) ---
    Kp = _round_up(K, 128)
    OCp = _round_up(OC, 128)

    vmem_budget = _vmem_budget_bytes()
    if block_m is None:
        block_m = _pick_block_m(M, Kp, OCp, vmem_budget)
    Mp = _round_up(M, block_m)

    patches = jnp.pad(patches, ((0, Mp - M), (0, Kp - K)))
    w2d = jnp.pad(w2d, ((0, Kp - K), (0, OCp - OC)))
    gamma_p = jnp.pad(gamma.astype(jnp.float32), (0, OCp - OC))
    beta_p = jnp.pad(beta.astype(jnp.float32), (0, OCp - OC))

    num_tiles = Mp // block_m

    # --- pass 1: conv-as-matmul, bf16 y to HBM + global per-channel stats ---
    y_bf16, stats = pl.pallas_call(
        _conv_stats_kernel,
        out_shape=(
            jax.ShapeDtypeStruct((Mp, OCp), jnp.bfloat16),
            jax.ShapeDtypeStruct((8, OCp), jnp.float32),
        ),
        grid=(num_tiles,),
        in_specs=[
            pl.BlockSpec((block_m, Kp), lambda i: (i, 0)),
            pl.BlockSpec((Kp, OCp), lambda i: (0, 0)),
        ],
        out_specs=[
            pl.BlockSpec((block_m, OCp), lambda i: (i, 0)),
            pl.BlockSpec((8, OCp), lambda i: (0, 0)),
        ],
        scratch_shapes=[pltpu.VMEM((8, OCp), jnp.float32)],
        compiler_params=pltpu.CompilerParams(
            dimension_semantics=("arbitrary",),
            vmem_limit_bytes=vmem_budget,
        ),
    )(patches, w2d)

    # --- per-channel glue (tiny): BN batch stats -> fused scale / shift ---
    # Divide by the true M (padded zero rows added nothing to the sums).
    # TODO(synk): for very large M with |mean| >> std, switch to shifted-sum /
    # Welford merges to avoid E[y^2]-E[y]^2 cancellation.
    mean = stats[0] / M
    var = jnp.maximum(stats[1] / M - mean * mean, 0.0)  # biased var, training BN
    inv = lax.rsqrt(var + EPS)
    scale = (gamma_p * inv).reshape(1, OCp)
    shift = (beta_p - mean * gamma_p * inv).reshape(1, OCp)

    # --- pass 2: matmul-free BN affine + ReLU over the bf16 y, lane-dense ---
    # TODO(synk): emit bf16 output here if the consumer tolerates it (halves store bytes).
    out2d = pl.pallas_call(
        _bn_relu_kernel,
        out_shape=jax.ShapeDtypeStruct((Mp, OCp), jnp.float32),
        grid=(num_tiles,),
        in_specs=[
            pl.BlockSpec((block_m, OCp), lambda i: (i, 0)),
            pl.BlockSpec((1, OCp), lambda i: (0, 0)),
            pl.BlockSpec((1, OCp), lambda i: (0, 0)),
        ],
        out_specs=pl.BlockSpec((block_m, OCp), lambda i: (i, 0)),
        compiler_params=pltpu.CompilerParams(
            dimension_semantics=("parallel",),
            vmem_limit_bytes=vmem_budget,
        ),
    )(y_bf16, scale, shift)

    out = out2d[:M, :OC].reshape(N, OH, OW, OC)
    return jnp.transpose(out, (0, 3, 1, 2))  # back to NCHW
    # TODO(synk): BatchNorm2d's running_mean/running_var momentum update is a
    # training-time buffer mutation (not part of the returned output); omitted.


def _reference(x, weight, gamma, beta, *, stride=1, padding=1):
    """Pure-JAX reference matching PyTorch BN_Conv2d forward (training-mode BN)."""
    y = lax.conv_general_dilated(
        x.astype(jnp.float32),
        weight.astype(jnp.float32),
        window_strides=(stride, stride),
        padding=((padding, padding), (padding, padding)),
        dimension_numbers=("NCHW", "OIHW", "NCHW"),
        precision=lax.Precision.HIGHEST,
    )
    mean = jnp.mean(y, axis=(0, 2, 3), keepdims=True)
    var = jnp.mean(jnp.square(y - mean), axis=(0, 2, 3), keepdims=True)
    y = (y - mean) * lax.rsqrt(var + EPS)
    y = y * gamma.reshape(1, -1, 1, 1) + beta.reshape(1, -1, 1, 1)
    return jnp.maximum(y, 0.0)


if __name__ == "__main__":
    # BN_Conv2d(in_channels=4, out_channels=8, kernel_size=3, stride=1, padding=1)
    N, C, H, W = 2, 4, 16, 16
    OC, KH, KW = 8, 3, 3
    stride, padding = 1, 1

    key = jax.random.PRNGKey(0)
    kx, kw, kg, kb = jax.random.split(key, 4)

    x = jax.random.normal(kx, (N, C, H, W), dtype=jnp.float32)
    weight = jax.random.normal(kw, (OC, C, KH, KW), dtype=jnp.float32)
    weight = weight * (2.0 / (C * KH * KW)) ** 0.5
    gamma = 1.0 + 0.1 * jax.random.normal(kg, (OC,), dtype=jnp.float32)
    beta = 0.1 * jax.random.normal(kb, (OC,), dtype=jnp.float32)

    fn = jax.jit(functools.partial(bn_conv2d, stride=stride, padding=padding))
    out = jax.block_until_ready(fn(x, weight, gamma, beta))

    ref = jax.block_until_ready(
        _reference(x, weight, gamma, beta, stride=stride, padding=padding)
    )

    assert out.shape == (N, OC, H, W), out.shape
    assert jnp.all(jnp.isfinite(out))
    # bf16 matmul inputs + bf16-stored y (f32 accumulation / f32 stats) vs f32
    # HIGHEST reference -> loosened tolerance.
    assert jnp.allclose(out, ref, atol=5e-2, rtol=5e-2), (
        float(jnp.max(jnp.abs(out - ref)))
    )
    print("KERNEL_OK")
</pallas_src>

<mosaic_0001>
module attributes {stable_mosaic.version = 11 : i64} {
  func.func @_conv_stats_kernel(%arg0: i32, %arg1: memref<512x128xbf16, #tpu.memory_space<vmem>>, %arg2: memref<128x128xbf16, #tpu.memory_space<vmem>>, %arg3: memref<512x128xbf16, #tpu.memory_space<vmem>>, %arg4: memref<8x128xf32, #tpu.memory_space<vmem>>, %arg5: memref<8x128xf32, #tpu.memory_space<vmem>>) attributes {dimension_semantics = [#tpu.dimension_semantics<arbitrary>], iteration_bounds = array<i64: 1>, scalar_prefetch = 0 : i64, scratch_operands = 1 : i64, tpu.core_type = #tpu.core_type<tc>, window_params = [{transform_indices = @transform_0, window_bounds = array<i64: 512, 128>}, {pipeline_mode = #tpu.pipeline_mode<synchronous>, transform_indices = @transform_1, window_bounds = array<i64: 128, 128>}, {transform_indices = @transform_2, window_bounds = array<i64: 512, 128>}, {pipeline_mode = #tpu.pipeline_mode<synchronous>, transform_indices = @transform_3, window_bounds = array<i64: 8, 128>}]} {
    %c0_i32 = arith.constant 0 : i32
    %0 = arith.cmpi eq, %arg0, %c0_i32 : i32
    %1 = arith.extui %0 : i1 to i32
    %c0_i32_0 = arith.constant 0 : i32
    %2 = arith.cmpi ne, %1, %c0_i32_0 : i32
    scf.if %2 {
      %cst_17 = arith.constant 0.000000e+00 : f32
      %22 = vector.broadcast %cst_17 : f32 to vector<8x128xf32>
      %c0_18 = arith.constant 0 : index
      %c0_19 = arith.constant 0 : index
      %23 = vector.load %arg5[%c0_18, %c0_19] : memref<8x128xf32, #tpu.memory_space<vmem>>, vector<8x128xf32>
      tpu.vector_store %arg5[%c0_18, %c0_19], %22 {strides = array<i32>} : memref<8x128xf32, #tpu.memory_space<vmem>>, vector<8x128xf32>,
    } else {
    }
    %c0 = arith.constant 0 : index
    %c0_1 = arith.constant 0 : index
    %3 = vector.load %arg1[%c0, %c0_1] : memref<512x128xbf16, #tpu.memory_space<vmem>>, vector<512x128xbf16>
    %c0_2 = arith.constant 0 : index
    %c0_3 = arith.constant 0 : index
    %4 = vector.load %arg2[%c0_2, %c0_3] : memref<128x128xbf16, #tpu.memory_space<vmem>>, vector<128x128xbf16>
    %cst = arith.constant dense<0.000000e+00> : vector<512x128xf32>
    %5 = tpu.matmul %3, %4, %cst {dimension_numbers = #tpu.dot_dimension_numbers<[1], [0], [0], [1], [0, 0, 1, 1], [], []>} : vector<512x128xbf16>, vector<128x128xbf16>, vector<512x128xf32> -> vector<512x128xf32>
    %6 = arith.truncf %5 : vector<512x128xf32> to vector<512x128xbf16>
    %c0_4 = arith.constant 0 : index
    %c0_5 = arith.constant 0 : index
    %7 = vector.load %arg3[%c0_4, %c0_5] : memref<512x128xbf16, #tpu.memory_space<vmem>>, vector<512x128xbf16>
    tpu.vector_store %arg3[%c0_4, %c0_5], %6 {strides = array<i32>} : memref<512x128xbf16, #tpu.memory_space<vmem>>, vector<512x128xbf16>,
    %c0_6 = arith.constant 0 : index
    %c0_7 = arith.constant 0 : index
    %8 = vector.load %arg5[%c0_6, %c0_7] : memref<8x128xf32, #tpu.memory_space<vmem>>, vector<1x128xf32>
    %cst_8 = arith.constant dense<0.000000e+00> : vector<128xf32>
    %9 = vector.multi_reduction <add>, %5, %cst_8 [0] : vector<512x128xf32> to vector<128xf32>
    %10 = vector.shape_cast %9 : vector<128xf32> to vector<1x128xf32>
    %11 = arith.addf %8, %10 : vector<1x128xf32>
    %c0_9 = arith.constant 0 : index
    %c0_10 = arith.constant 0 : index
    %12 = vector.load %arg5[%c0_9, %c0_10] : memref<8x128xf32, #tpu.memory_space<vmem>>, vector<1x128xf32>
    tpu.vector_store %arg5[%c0_9, %c0_10], %11 {strides = array<i32>} : memref<8x128xf32, #tpu.memory_space<vmem>>, vector<1x128xf32>,
    %c1 = arith.constant 1 : index
    %c0_11 = arith.constant 0 : index
    %13 = vector.load %arg5[%c1, %c0_11] : memref<8x128xf32, #tpu.memory_space<vmem>>, vector<1x128xf32>
    %14 = arith.mulf %5, %5 : vector<512x128xf32>
    %cst_12 = arith.constant dense<0.000000e+00> : vector<128xf32>
    %15 = vector.multi_reduction <add>, %14, %cst_12 [0] : vector<512x128xf32> to vector<128xf32>
    %16 = vector.shape_cast %15 : vector<128xf32> to vector<1x128xf32>
    %17 = arith.addf %13, %16 : vector<1x128xf32>
    %c1_13 = arith.constant 1 : index
    %c0_14 = arith.constant 0 : index
    %18 = vector.load %arg5[%c1_13, %c0_14] : memref<8x128xf32, #tpu.memory_space<vmem>>, vector<1x128xf32>
    tpu.vector_store %arg5[%c1_13, %c0_14], %17 {strides = array<i32>} : memref<8x128xf32, #tpu.memory_space<vmem>>, vector<1x128xf32>,
    %c0_i32_15 = arith.constant 0 : i32
    %19 = arith.cmpi eq, %arg0, %c0_i32_15 : i32
    %20 = arith.extui %19 : i1 to i32
    %c0_i32_16 = arith.constant 0 : i32
    %21 = arith.cmpi ne, %20, %c0_i32_16 : i32
    scf.if %21 {
      %c0_17 = arith.constant 0 : index
      %c0_18 = arith.constant 0 : index
      %22 = vector.load %arg5[%c0_17, %c0_18] : memref<8x128xf32, #tpu.memory_space<vmem>>, vector<8x128xf32>
      %c0_19 = arith.constant 0 : index
      %c0_20 = arith.constant 0 : index
      %23 = vector.load %arg4[%c0_19, %c0_20] : memref<8x128xf32, #tpu.memory_space<vmem>>, vector<8x128xf32>
      tpu.vector_store %arg4[%c0_19, %c0_20], %22 {strides = array<i32>} : memref<8x128xf32, #tpu.memory_space<vmem>>, vector<8x128xf32>,
    } else {
    }
    return
  }
  func.func @transform_0(%arg0: i32) -> (i32, i32) {
    %c0_i32 = arith.constant 0 : i32
    %c0_i32_0 = arith.constant 0 : i32
    return %arg0, %c0_i32 : i32, i32
  }
  func.func @transform_1(%arg0: i32) -> (i32, i32) {
    %c0_i32 = arith.constant 0 : i32
    %c0_i32_0 = arith.constant 0 : i32
    %c0_i32_1 = arith.constant 0 : i32
    return %c0_i32, %c0_i32_0 : i32, i32
  }
  func.func @transform_2(%arg0: i32) -> (i32, i32) {
    %c0_i32 = arith.constant 0 : i32
    %c0_i32_0 = arith.constant 0 : i32
    return %arg0, %c0_i32 : i32, i32
  }
  func.func @transform_3(%arg0: i32) -> (i32, i32) {
    %c0_i32 = arith.constant 0 : i32
    %c0_i32_0 = arith.constant 0 : i32
    %c0_i32_1 = arith.constant 0 : i32
    return %c0_i32, %c0_i32_0 : i32, i32
  }
}

module attributes {stable_mosaic.version = 11 : i64} {
  func.func @_bn_relu_kernel(%arg0: i32, %arg1: memref<512x128xbf16, #tpu.memory_space<vmem>>, %arg2: memref<1x128xf32, #tpu.memory_space<vmem>>, %arg3: memref<1x128xf32, #tpu.memory_space<vmem>>, %arg4: memref<512x128xf32, #tpu.memory_space<vmem>>) attributes {dimension_semantics = [#tpu.dimension_semantics<parallel>], iteration_bounds = array<i64: 1>, scalar_prefetch = 0 : i64, scratch_operands = 0 : i64, tpu.core_type = #tpu.core_type<tc>, window_params = [{transform_indices = @transform_0, window_bounds = array<i64: 512, 128>}, {pipeline_mode = #tpu.pipeline_mode<synchronous>, transform_indices = @transform_1, window_bounds = array<i64: 1, 128>}, {pipeline_mode = #tpu.pipeline_mode<synchronous>, transform_indices = @transform_2, window_bounds = array<i64: 1, 128>}, {transform_indices = @transform_3, window_bounds = array<i64: 512, 128>}]} {
    %c0 = arith.constant 0 : index
    %c0_0 = arith.constant 0 : index
    %0 = vector.load %arg1[%c0, %c0_0] : memref<512x128xbf16, #tpu.memory_space<vmem>>, vector<512x128xbf16>
    %1 = arith.extf %0 : vector<512x128xbf16> to vector<512x128xf32>
    %c0_1 = arith.constant 0 : index
    %c0_2 = arith.constant 0 : index
    %2 = vector.load %arg2[%c0_1, %c0_2] : memref<1x128xf32, #tpu.memory_space<vmem>>, vector<1x128xf32>
    %3 = vector.broadcast %2 : vector<1x128xf32> to vector<512x128xf32>
    %4 = arith.mulf %1, %3 : vector<512x128xf32>
    %c0_3 = arith.constant 0 : index
    %c0_4 = arith.constant 0 : index
    %5 = vector.load %arg3[%c0_3, %c0_4] : memref<1x128xf32, #tpu.memory_space<vmem>>, vector<1x128xf32>
    %6 = vector.broadcast %5 : vector<1x128xf32> to vector<512x128xf32>
    %7 = arith.addf %4, %6 : vector<512x128xf32>
    %cst = arith.constant 0.000000e+00 : f32
    %8 = vector.broadcast %cst : f32 to vector<512x128xf32>
    %9 = arith.maximumf %7, %8 : vector<512x128xf32>
    %c0_5 = arith.constant 0 : index
    %c0_6 = arith.constant 0 : index
    %10 = vector.load %arg4[%c0_5, %c0_6] : memref<512x128xf32, #tpu.memory_space<vmem>>, vector<512x128xf32>
    tpu.vector_store %arg4[%c0_5, %c0_6], %9 {strides = array<i32>} : memref<512x128xf32, #tpu.memory_space<vmem>>, vector<512x128xf32>,
    return
  }
  func.func @transform_0(%arg0: i32) -> (i32, i32) {
    %c0_i32 = arith.constant 0 : i32
    %c0_i32_0 = arith.constant 0 : i32
    return %arg0, %c0_i32 : i32, i32
  }
  func.func @transform_1(%arg0: i32) -> (i32, i32) {
    %c0_i32 = arith.constant 0 : i32
    %c0_i32_0 = arith.constant 0 : i32
    %c0_i32_1 = arith.constant 0 : i32
    return %c0_i32, %c0_i32_0 : i32, i32
  }
  func.func @transform_2(%arg0: i32) -> (i32, i32) {
    %c0_i32 = arith.constant 0 : i32
    %c0_i32_0 = arith.constant 0 : i32
    %c0_i32_1 = arith.constant 0 : i32
    return %c0_i32, %c0_i32_0 : i32, i32
  }
  func.func @transform_3(%arg0: i32) -> (i32, i32) {
    %c0_i32 = arith.constant 0 : i32
    %c0_i32_0 = arith.constant 0 : i32
    return %arg0, %c0_i32 : i32, i32
  }
}

</mosaic_0001>

<bundles_post_ra>
// kernel: bn_conv2d.3
= control target key start
LH: loop header
LB: loop body
LE: loop exit
PB: predicated region body
PF: predicated region fallthrough
CT: control target
= control target key end

     0   :  { %s1023_s0 = inlined_call_operand.vmem [shape: bf16[512,128], index: 0, kind: input, shape index: {}]   ;;  %s1024_s1 = inlined_call_operand.vmem [shape: f32[1,128], index: 1, kind: input, shape index: {}]   ;;  %s1025_s2 = inlined_call_operand.vmem [shape: f32[1,128], index: 2, kind: input, shape index: {}]   ;;  %s1026_s3 = inlined_call_operand.vmem [shape: f32[512,128], index: 3, kind: output, shape index: {}]  }
   0x1   :  { %v419_v0 = vld [vmem:[%s1023_s0] sm:$0xff]   ;;  %v546_v4 = vld [vmem:[%s1023_s0 + $0x8] sm:$0xff]   ;;  %v547_v5 = vld [vmem:[%s1023_s0 + $0x10] sm:$0xff]  }
   0x2   :  { %v603_v1 = vld [vmem:[%s1024_s1] ss:$0 sm:$0xff]  ;;  %v420_v2 = vunpack.c.l.bf16 %v419_v0  ;;  %v421_v3 = vunpack.c.h.bf16 %v419_v0  ;;  %v548_v6 = vld [vmem:[%s1023_s0 + $0x18] sm:$0xff]   ;;  %v424_v8 = vunpack.c.l.bf16 %v546_v4  ;;  %v425_v9 = vunpack.c.h.bf16 %v546_v4  ;;  %v550_v33 = vld [vmem:[%s1023_s0 + $0x28] sm:$0xff]  }
   0x3   :  { %v617_v7 = vld [vmem:[%s1025_s2] ss:$0 sm:$0xff]  ;;  %v428_v10 = vunpack.c.l.bf16 %v547_v5  ;;  %v429_v11 = vunpack.c.h.bf16 %v547_v5  ;;  %v432_v14 = vunpack.c.l.bf16 %v548_v6  ;;  %v433_v15 = vunpack.c.h.bf16 %v548_v6  ;;  %v551_v34 = vld [vmem:[%s1023_s0 + $0x30] sm:$0xff]   ;;  %v552_v39 = vld [vmem:[%s1023_s0 + $0x38] sm:$0xff]  }
   0x4   :  { %v149_v12 = vmul.f32 %v420_v2, %v603_v1  ;;  %v150_v13 = vmul.f32 %v421_v3, %v603_v1  ;;  %v151_v16 = vmul.f32 %v424_v8, %v603_v1  ;;  %v152_v17 = vmul.f32 %v425_v9, %v603_v1  ;;  %v549_v28 = vld [vmem:[%s1023_s0 + $0x20] sm:$0xff]   ;;  %v554_v6 = vld [vmem:[%s1023_s0 + $0x48] sm:$0xff]   ;;  %v555_v8 = vld [vmem:[%s1023_s0 + $0x50] sm:$0xff]  }
   0x5   :  { %v153_v18 = vmul.f32 %v428_v10, %v603_v1  ;;  %v154_v19 = vmul.f32 %v429_v11, %v603_v1  ;;  %v155_v22 = vmul.f32 %v432_v14, %v603_v1  ;;  %v156_v23 = vmul.f32 %v433_v15, %v603_v1  ;;  %v553_v0 = vld [vmem:[%s1023_s0 + $0x40] sm:$0xff]  }
   0x6   :  { %v220_v20 = vadd.f32 %v617_v7, %v149_v12  ;;  %v221_v21 = vadd.f32 %v617_v7, %v150_v13  ;;  %v222_v24 = vadd.f32 %v617_v7, %v151_v16  ;;  %v223_v25 = vadd.f32 %v617_v7, %v152_v17  ;;  %v556_v13 = vld [vmem:[%s1023_s0 + $0x58] sm:$0xff]  }
   0x7   :  { %v224_v26 = vadd.f32 %v617_v7, %v153_v18  ;;  %v225_v27 = vadd.f32 %v617_v7, %v154_v19  ;;  %v226_v31 = vadd.f32 %v617_v7, %v155_v22  ;;  %v227_v32 = vadd.f32 %v617_v7, %v156_v23 }
   0x8   :  { %v284_v29 = vmax.f32 %v220_v20, 0.0  ;;  %v285_v30 = vmax.f32 %v221_v21, 0.0  ;;  %v286_v35 = vmax.f32 %v222_v24, 0.0  ;;  %v287_v36 = vmax.f32 %v223_v25, 0.0 }
   0x9   :  { %v288_v37 = vmax.f32 %v224_v26, 0.0  ;;  %v289_v38 = vmax.f32 %v225_v27, 0.0  ;;  %v290_v40 = vmax.f32 %v226_v31, 0.0  ;;  %v291_v41 = vmax.f32 %v227_v32, 0.0 }
   0xa   :  { %348 = vst [vmem:[%s1026_s3] sm:$0xff] %v284_v29  ;;  %349 = vst [vmem:[%s1026_s3 + $0x8] sm:$0xff] %v285_v30  ;;  %v436_v42 = vunpack.c.l.bf16 %v549_v28  ;;  %v437_v43 = vunpack.c.h.bf16 %v549_v28  ;;  %v440_v44 = vunpack.c.l.bf16 %v550_v33  ;;  %v441_v45 = vunpack.c.h.bf16 %v550_v33 }
   0xb   :  { %350 = vst [vmem:[%s1026_s3 + $0x10] sm:$0xff] %v286_v35  ;;  %351 = vst [vmem:[%s1026_s3 + $0x18] sm:$0xff] %v287_v36  ;;  %v444_v46 = vunpack.c.l.bf16 %v551_v34  ;;  %v445_v47 = vunpack.c.h.bf16 %v551_v34  ;;  %v448_v50 = vunpack.c.l.bf16 %v552_v39  ;;  %v449_v51 = vunpack.c.h.bf16 %v552_v39 }
   0xc   :  { %352 = vst [vmem:[%s1026_s3 + $0x20] sm:$0xff] %v288_v37  ;;  %353 = vst [vmem:[%s1026_s3 + $0x28] sm:$0xff] %v289_v38  ;;  %v157_v48 = vmul.f32 %v436_v42, %v603_v1  ;;  %v158_v49 = vmul.f32 %v437_v43, %v603_v1  ;;  %v159_v52 = vmul.f32 %v440_v44, %v603_v1  ;;  %v452_v16 = vunpack.c.l.bf16 %v553_v0  ;;  %v557_v38 = vld [vmem:[%s1023_s0 + $0x60] sm:$0xff]   ;;  %v558_v43 = vld [vmem:[%s1023_s0 + $0x68] sm:$0xff]  }
   0xd   :  { %354 = vst [vmem:[%s1026_s3 + $0x30] sm:$0xff] %v290_v40  ;;  %355 = vst [vmem:[%s1026_s3 + $0x38] sm:$0xff] %v291_v41  ;;  %v160_v53 = vmul.f32 %v441_v45, %v603_v1  ;;  %v161_v54 = vmul.f32 %v444_v46, %v603_v1  ;;  %v162_v55 = vmul.f32 %v445_v47, %v603_v1  ;;  %v453_v17 = vunpack.c.h.bf16 %v553_v0  ;;  %v559_v44 = vld [vmem:[%s1023_s0 + $0x70] sm:$0xff]  }
   0xe   :  { %v228_v56 = vadd.f32 %v617_v7, %v157_v48  ;;  %v229_v57 = vadd.f32 %v617_v7, %v158_v49  ;;  %v163_v58 = vmul.f32 %v448_v50, %v603_v1  ;;  %v164_v59 = vmul.f32 %v449_v51, %v603_v1  ;;  %v560_v49 = vld [vmem:[%s1023_s0 + $0x78] sm:$0xff]  }
   0xf   :  { %v230_v60 = vadd.f32 %v617_v7, %v159_v52  ;;  %v231_v61 = vadd.f32 %v617_v7, %v160_v53  ;;  %v232_v62 = vadd.f32 %v617_v7, %v161_v54  ;;  %v233_v63 = vadd.f32 %v617_v7, %v162_v55 }
  0x10   :  { %v292_v2 = vmax.f32 %v228_v56, 0.0  ;;  %v293_v3 = vmax.f32 %v229_v57, 0.0  ;;  %v234_v4 = vadd.f32 %v617_v7, %v163_v58  ;;  %v235_v5 = vadd.f32 %v617_v7, %v164_v59 }
  0x11   :  { %v294_v9 = vmax.f32 %v230_v60, 0.0  ;;  %v295_v10 = vmax.f32 %v231_v61, 0.0  ;;  %v296_v11 = vmax.f32 %v232_v62, 0.0  ;;  %v297_v12 = vmax.f32 %v233_v63, 0.0 }
  0x12   :  { %356 = vst [vmem:[%s1026_s3 + $0x40] sm:$0xff] %v292_v2  ;;  %357 = vst [vmem:[%s1026_s3 + $0x48] sm:$0xff] %v293_v3  ;;  %v298_v14 = vmax.f32 %v234_v4, 0.0  ;;  %v299_v15 = vmax.f32 %v235_v5, 0.0  ;;  %v456_v18 = vunpack.c.l.bf16 %v554_v6  ;;  %v457_v19 = vunpack.c.h.bf16 %v554_v6 }
  0x13   :  { %358 = vst [vmem:[%s1026_s3 + $0x50] sm:$0xff] %v294_v9  ;;  %359 = vst [vmem:[%s1026_s3 + $0x58] sm:$0xff] %v295_v10  ;;  %v460_v20 = vunpack.c.l.bf16 %v555_v8  ;;  %v461_v21 = vunpack.c.h.bf16 %v555_v8  ;;  %v165_v22 = vmul.f32 %v452_v16, %v603_v1  ;;  %v166_v23 = vmul.f32 %v453_v17, %v603_v1  ;;  %v562_v17 = vld [vmem:[%s1023_s0 + $0x88] sm:$0xff]  }
  0x14   :  { %360 = vst [vmem:[%s1026_s3 + $0x60] sm:$0xff] %v296_v11  ;;  %361 = vst [vmem:[%s1026_s3 + $0x68] sm:$0xff] %v297_v12  ;;  %v464_v24 = vunpack.c.l.bf16 %v556_v13  ;;  %v465_v25 = vunpack.c.h.bf16 %v556_v13  ;;  %v167_v26 = vmul.f32 %v456_v18, %v603_v1  ;;  %v168_v27 = vmul.f32 %v457_v19, %v603_v1  ;;  %v561_v12 = vld [vmem:[%s1023_s0 + $0x80] sm:$0xff]   ;;  %v563_v18 = vld [vmem:[%s1023_s0 + $0x90] sm:$0xff]  }
  0x15   :  { %362 = vst [vmem:[%s1026_s3 + $0x70] sm:$0xff] %v298_v14  ;;  %363 = vst [vmem:[%s1026_s3 + $0x78] sm:$0xff] %v299_v15  ;;  %v169_v28 = vmul.f32 %v460_v20, %v603_v1  ;;  %v170_v29 = vmul.f32 %v461_v21, %v603_v1  ;;  %v236_v30 = vadd.f32 %v617_v7, %v165_v22  ;;  %v468_v52 = vunpack.c.l.bf16 %v557_v38 }
  0x16   :  { %v237_v31 = vadd.f32 %v617_v7, %v166_v23  ;;  %v171_v32 = vmul.f32 %v464_v24, %v603_v1  ;;  %v172_v33 = vmul.f32 %v465_v25, %v603_v1  ;;  %v238_v34 = vadd.f32 %v617_v7, %v167_v26  ;;  %v564_v23 = vld [vmem:[%s1023_s0 + $0x98] sm:$0xff]  }
  0x17   :  { %v239_v35 = vadd.f32 %v617_v7, %v168_v27  ;;  %v240_v36 = vadd.f32 %v617_v7, %v169_v28  ;;  %v241_v37 = vadd.f32 %v617_v7, %v170_v29  ;;  %v300_v39 = vmax.f32 %v236_v30, 0.0 }
  0x18   :  { %v301_v40 = vmax.f32 %v237_v31, 0.0  ;;  %v242_v41 = vadd.f32 %v617_v7, %v171_v32  ;;  %v243_v42 = vadd.f32 %v617_v7, %v172_v33  ;;  %v302_v45 = vmax.f32 %v238_v34, 0.0 }
  0x19   :  { %v303_v46 = vmax.f32 %v239_v35, 0.0  ;;  %v304_v47 = vmax.f32 %v240_v36, 0.0  ;;  %v305_v48 = vmax.f32 %v241_v37, 0.0  ;;  %364 = vst [vmem:[%s1026_s3 + $0x80] sm:$0xff] %v300_v39  ;;  %v469_v53 = vunpack.c.h.bf16 %v557_v38 }
  0x1a   :  { %365 = vst [vmem:[%s1026_s3 + $0x88] sm:$0xff] %v301_v40  ;;  %v306_v50 = vmax.f32 %v242_v41, 0.0  ;;  %v307_v51 = vmax.f32 %v243_v42, 0.0  ;;  %366 = vst [vmem:[%s1026_s3 + $0x90] sm:$0xff] %v302_v45  ;;  %v472_v54 = vunpack.c.l.bf16 %v558_v43  ;;  %v473_v55 = vunpack.c.h.bf16 %v558_v43 }
  0x1b   :  { %367 = vst [vmem:[%s1026_s3 + $0x98] sm:$0xff] %v303_v46  ;;  %368 = vst [vmem:[%s1026_s3 + $0xa0] sm:$0xff] %v304_v47  ;;  %v476_v56 = vunpack.c.l.bf16 %v559_v44  ;;  %v477_v57 = vunpack.c.h.bf16 %v559_v44  ;;  %v173_v58 = vmul.f32 %v468_v52, %v603_v1  ;;  %v174_v59 = vmul.f32 %v469_v53, %v603_v1  ;;  %v566_v53 = vld [vmem:[%s1023_s0 + $0xa8] sm:$0xff]  }
  0x1c   :  { %369 = vst [vmem:[%s1026_s3 + $0xa8] sm:$0xff] %v305_v48  ;;  %370 = vst [vmem:[%s1026_s3 + $0xb0] sm:$0xff] %v306_v50  ;;  %v480_v60 = vunpack.c.l.bf16 %v560_v49  ;;  %v481_v61 = vunpack.c.h.bf16 %v560_v49  ;;  %v175_v62 = vmul.f32 %v472_v54, %v603_v1  ;;  %v176_v63 = vmul.f32 %v473_v55, %v603_v1  ;;  %v565_v48 = vld [vmem:[%s1023_s0 + $0xa0] sm:$0xff]   ;;  %v567_v54 = vld [vmem:[%s1023_s0 + $0xb0] sm:$0xff]  }
  0x1d   :  { %371 = vst [vmem:[%s1026_s3 + $0xb8] sm:$0xff] %v307_v51  ;;  %v177_v0 = vmul.f32 %v476_v56, %v603_v1  ;;  %v178_v2 = vmul.f32 %v477_v57, %v603_v1  ;;  %v244_v3 = vadd.f32 %v617_v7, %v173_v58  ;;  %v245_v4 = vadd.f32 %v617_v7, %v174_v59  ;;  %v568_v59 = vld [vmem:[%s1023_s0 + $0xb8] sm:$0xff]  }
  0x1e   :  { %v179_v5 = vmul.f32 %v480_v60, %v603_v1  ;;  %v180_v6 = vmul.f32 %v481_v61, %v603_v1  ;;  %v246_v8 = vadd.f32 %v617_v7, %v175_v62  ;;  %v247_v9 = vadd.f32 %v617_v7, %v176_v63 }
  0x1f   :  { %v248_v10 = vadd.f32 %v617_v7, %v177_v0  ;;  %v249_v11 = vadd.f32 %v617_v7, %v178_v2  ;;  %v308_v13 = vmax.f32 %v244_v3, 0.0  ;;  %v309_v14 = vmax.f32 %v245_v4, 0.0 }
  0x20   :  { %v250_v15 = vadd.f32 %v617_v7, %v179_v5  ;;  %v251_v16 = vadd.f32 %v617_v7, %v180_v6  ;;  %v310_v19 = vmax.f32 %v246_v8, 0.0  ;;  %v311_v20 = vmax.f32 %v247_v9, 0.0 }
  0x21   :  { %v312_v21 = vmax.f32 %v248_v10, 0.0  ;;  %v313_v22 = vmax.f32 %v249_v11, 0.0  ;;  %372 = vst [vmem:[%s1026_s3 + $0xc0] sm:$0xff] %v308_v13  ;;  %373 = vst [vmem:[%s1026_s3 + $0xc8] sm:$0xff] %v309_v14  ;;  %v484_v26 = vunpack.c.l.bf16 %v561_v12  ;;  %v485_v27 = vunpack.c.h.bf16 %v561_v12 }
  0x22   :  { %v314_v24 = vmax.f32 %v250_v15, 0.0  ;;  %v315_v25 = vmax.f32 %v251_v16, 0.0  ;;  %374 = vst [vmem:[%s1026_s3 + $0xd0] sm:$0xff] %v310_v19  ;;  %375 = vst [vmem:[%s1026_s3 + $0xd8] sm:$0xff] %v311_v20  ;;  %v488_v28 = vunpack.c.l.bf16 %v562_v17  ;;  %v489_v29 = vunpack.c.h.bf16 %v562_v17 }
  0x23   :  { %376 = vst [vmem:[%s1026_s3 + $0xe0] sm:$0xff] %v312_v21  ;;  %377 = vst [vmem:[%s1026_s3 + $0xe8] sm:$0xff] %v313_v22  ;;  %v492_v30 = vunpack.c.l.bf16 %v563_v18  ;;  %v493_v31 = vunpack.c.h.bf16 %v563_v18  ;;  %v181_v32 = vmul.f32 %v484_v26, %v603_v1  ;;  %v182_v33 = vmul.f32 %v485_v27, %v603_v1  ;;  %v569_v22 = vld [vmem:[%s1023_s0 + $0xc0] sm:$0xff]   ;;  %v570_v27 = vld [vmem:[%s1023_s0 + $0xc8] sm:$0xff]  }
  0x24   :  { %378 = vst [vmem:[%s1026_s3 + $0xf0] sm:$0xff] %v314_v24  ;;  %379 = vst [vmem:[%s1026_s3 + $0xf8] sm:$0xff] %v315_v25  ;;  %v496_v34 = vunpack.c.l.bf16 %v564_v23  ;;  %v497_v35 = vunpack.c.h.bf16 %v564_v23  ;;  %v183_v36 = vmul.f32 %v488_v28, %v603_v1  ;;  %v184_v37 = vmul.f32 %v489_v29, %v603_v1  ;;  %v571_v28 = vld [vmem:[%s1023_s0 + $0xd0] sm:$0xff]  }
  0x25   :  { %v185_v38 = vmul.f32 %v492_v30, %v603_v1  ;;  %v186_v39 = vmul.f32 %v493_v31, %v603_v1  ;;  %v252_v40 = vadd.f32 %v617_v7, %v181_v32  ;;  %v253_v41 = vadd.f32 %v617_v7, %v182_v33  ;;  %v572_v33 = vld [vmem:[%s1023_s0 + $0xd8] sm:$0xff]  }
  0x26   :  { %v187_v42 = vmul.f32 %v496_v34, %v603_v1  ;;  %v188_v43 = vmul.f32 %v497_v35, %v603_v1  ;;  %v254_v44 = vadd.f32 %v617_v7, %v183_v36  ;;  %v255_v45 = vadd.f32 %v617_v7, %v184_v37 }
  0x27   :  { %v256_v46 = vadd.f32 %v617_v7, %v185_v38  ;;  %v257_v47 = vadd.f32 %v617_v7, %v186_v39  ;;  %v316_v49 = vmax.f32 %v252_v40, 0.0  ;;  %v317_v50 = vmax.f32 %v253_v41, 0.0 }
  0x28   :  { %v258_v51 = vadd.f32 %v617_v7, %v187_v42  ;;  %v259_v52 = vadd.f32 %v617_v7, %v188_v43  ;;  %v318_v55 = vmax.f32 %v254_v44, 0.0  ;;  %v319_v56 = vmax.f32 %v255_v45, 0.0 }
  0x29   :  { %v320_v57 = vmax.f32 %v256_v46, 0.0  ;;  %v321_v58 = vmax.f32 %v257_v47, 0.0  ;;  %380 = vst [vmem:[%s1026_s3 + $0x100] sm:$0xff] %v316_v49  ;;  %381 = vst [vmem:[%s1026_s3 + $0x108] sm:$0xff] %v317_v50  ;;  %v500_v62 = vunpack.c.l.bf16 %v565_v48  ;;  %v501_v63 = vunpack.c.h.bf16 %v565_v48 }
  0x2a   :  { %v322_v60 = vmax.f32 %v258_v51, 0.0  ;;  %v323_v61 = vmax.f32 %v259_v52, 0.0  ;;  %382 = vst [vmem:[%s1026_s3 + $0x110] sm:$0xff] %v318_v55  ;;  %383 = vst [vmem:[%s1026_s3 + $0x118] sm:$0xff] %v319_v56  ;;  %v504_v0 = vunpack.c.l.bf16 %v566_v53  ;;  %v505_v2 = vunpack.c.h.bf16 %v566_v53 }
  0x2b   :  { %384 = vst [vmem:[%s1026_s3 + $0x120] sm:$0xff] %v320_v57  ;;  %385 = vst [vmem:[%s1026_s3 + $0x128] sm:$0xff] %v321_v58  ;;  %v508_v3 = vunpack.c.l.bf16 %v567_v54  ;;  %v509_v4 = vunpack.c.h.bf16 %v567_v54  ;;  %v189_v5 = vmul.f32 %v500_v62, %v603_v1  ;;  %v190_v6 = vmul.f32 %v501_v63, %v603_v1  ;;  %v573_v58 = vld [vmem:[%s1023_s0 + $0xe0] sm:$0xff]   ;;  %v574_v63 = vld [vmem:[%s1023_s0 + $0xe8] sm:$0xff]  }
  0x2c   :  { %386 = vst [vmem:[%s1026_s3 + $0x130] sm:$0xff] %v322_v60  ;;  %387 = vst [vmem:[%s1026_s3 + $0x138] sm:$0xff] %v323_v61  ;;  %v512_v8 = vunpack.c.l.bf16 %v568_v59  ;;  %v513_v9 = vunpack.c.h.bf16 %v568_v59  ;;  %v191_v10 = vmul.f32 %v504_v0, %v603_v1  ;;  %v192_v11 = vmul.f32 %v505_v2, %v603_v1  ;;  %v575_v0 = vld [vmem:[%s1023_s0 + $0xf0] sm:$0xff]  }
  0x2d   :  { %v193_v12 = vmul.f32 %v508_v3, %v603_v1  ;;  %v194_v13 = vmul.f32 %v509_v4, %v603_v1  ;;  %v260_v14 = vadd.f32 %v617_v7, %v189_v5  ;;  %v261_v15 = vadd.f32 %v617_v7, %v190_v6  ;;  %v576_v6 = vld [vmem:[%s1023_s0 + $0xf8] sm:$0xff]  }
  0x2e   :  { %v195_v16 = vmul.f32 %v512_v8, %v603_v1  ;;  %v196_v17 = vmul.f32 %v513_v9, %v603_v1  ;;  %v262_v18 = vadd.f32 %v617_v7, %v191_v10  ;;  %v263_v19 = vadd.f32 %v617_v7, %v192_v11 }
  0x2f   :  { %v264_v20 = vadd.f32 %v617_v7, %v193_v12  ;;  %v265_v21 = vadd.f32 %v617_v7, %v194_v13  ;;  %v324_v23 = vmax.f32 %v260_v14, 0.0  ;;  %v325_v24 = vmax.f32 %v261_v15, 0.0 }
  0x30   :  { %v266_v25 = vadd.f32 %v617_v7, %v195_v16  ;;  %v267_v26 = vadd.f32 %v617_v7, %v196_v17  ;;  %v326_v29 = vmax.f32 %v262_v18, 0.0  ;;  %v327_v30 = vmax.f32 %v263_v19, 0.0 }
  0x31   :  { %v328_v31 = vmax.f32 %v264_v20, 0.0  ;;  %v329_v32 = vmax.f32 %v265_v21, 0.0  ;;  %388 = vst [vmem:[%s1026_s3 + $0x140] sm:$0xff] %v324_v23  ;;  %389 = vst [vmem:[%s1026_s3 + $0x148] sm:$0xff] %v325_v24  ;;  %v516_v36 = vunpack.c.l.bf16 %v569_v22  ;;  %v517_v37 = vunpack.c.h.bf16 %v569_v22 }
  0x32   :  { %v330_v34 = vmax.f32 %v266_v25, 0.0  ;;  %v331_v35 = vmax.f32 %v267_v26, 0.0  ;;  %390 = vst [vmem:[%s1026_s3 + $0x150] sm:$0xff] %v326_v29  ;;  %391 = vst [vmem:[%s1026_s3 + $0x158] sm:$0xff] %v327_v30  ;;  %v520_v38 = vunpack.c.l.bf16 %v570_v27  ;;  %v521_v39 = vunpack.c.h.bf16 %v570_v27 }
  0x33   :  { %392 = vst [vmem:[%s1026_s3 + $0x160] sm:$0xff] %v328_v31  ;;  %393 = vst [vmem:[%s1026_s3 + $0x168] sm:$0xff] %v329_v32  ;;  %v524_v40 = vunpack.c.l.bf16 %v571_v28  ;;  %v525_v41 = vunpack.c.h.bf16 %v571_v28  ;;  %v197_v42 = vmul.f32 %v516_v36, %v603_v1  ;;  %v198_v43 = vmul.f32 %v517_v37, %v603_v1 }
  0x34   :  { %394 = vst [vmem:[%s1026_s3 + $0x170] sm:$0xff] %v330_v34  ;;  %395 = vst [vmem:[%s1026_s3 + $0x178] sm:$0xff] %v331_v35  ;;  %v528_v44 = vunpack.c.l.bf16 %v572_v33  ;;  %v529_v45 = vunpack.c.h.bf16 %v572_v33  ;;  %v199_v46 = vmul.f32 %v520_v38, %v603_v1  ;;  %v200_v47 = vmul.f32 %v521_v39, %v603_v1 }
  0x35   :  { %v201_v48 = vmul.f32 %v524_v40, %v603_v1  ;;  %v202_v49 = vmul.f32 %v525_v41, %v603_v1  ;;  %v268_v50 = vadd.f32 %v617_v7, %v197_v42  ;;  %v269_v51 = vadd.f32 %v617_v7, %v198_v43 }
  0x36   :  { %v203_v52 = vmul.f32 %v528_v44, %v603_v1  ;;  %v204_v53 = vmul.f32 %v529_v45, %v603_v1  ;;  %v270_v54 = vadd.f32 %v617_v7, %v199_v46  ;;  %v271_v55 = vadd.f32 %v617_v7, %v200_v47 }
  0x37   :  { %v272_v56 = vadd.f32 %v617_v7, %v201_v48  ;;  %v273_v57 = vadd.f32 %v617_v7, %v202_v49  ;;  %v332_v59 = vmax.f32 %v268_v50, 0.0  ;;  %v333_v60 = vmax.f32 %v269_v51, 0.0 }
  0x38   :  { %v274_v61 = vadd.f32 %v617_v7, %v203_v52  ;;  %v275_v62 = vadd.f32 %v617_v7, %v204_v53  ;;  %v334_v2 = vmax.f32 %v270_v54, 0.0  ;;  %v335_v3 = vmax.f32 %v271_v55, 0.0 }
  0x39   :  { %v336_v4 = vmax.f32 %v272_v56, 0.0  ;;  %v337_v5 = vmax.f32 %v273_v57, 0.0  ;;  %396 = vst [vmem:[%s1026_s3 + $0x180] sm:$0xff] %v332_v59  ;;  %397 = vst [vmem:[%s1026_s3 + $0x188] sm:$0xff] %v333_v60  ;;  %v532_v10 = vunpack.c.l.bf16 %v573_v58  ;;  %v533_v11 = vunpack.c.h.bf16 %v573_v58 }
  0x3a   :  { %v338_v8 = vmax.f32 %v274_v61, 0.0  ;;  %v339_v9 = vmax.f32 %v275_v62, 0.0  ;;  %398 = vst [vmem:[%s1026_s3 + $0x190] sm:$0xff] %v334_v2  ;;  %399 = vst [vmem:[%s1026_s3 + $0x198] sm:$0xff] %v335_v3  ;;  %v536_v12 = vunpack.c.l.bf16 %v574_v63  ;;  %v537_v13 = vunpack.c.h.bf16 %v574_v63 }
  0x3b   :  { %400 = vst [vmem:[%s1026_s3 + $0x1a0] sm:$0xff] %v336_v4  ;;  %401 = vst [vmem:[%s1026_s3 + $0x1a8] sm:$0xff] %v337_v5  ;;  %v540_v14 = vunpack.c.l.bf16 %v575_v0  ;;  %v541_v15 = vunpack.c.h.bf16 %v575_v0  ;;  %v205_v16 = vmul.f32 %v532_v10, %v603_v1  ;;  %v206_v17 = vmul.f32 %v533_v11, %v603_v1 }
  0x3c   :  { %402 = vst [vmem:[%s1026_s3 + $0x1b0] sm:$0xff] %v338_v8  ;;  %403 = vst [vmem:[%s1026_s3 + $0x1b8] sm:$0xff] %v339_v9  ;;  %v544_v18 = vunpack.c.l.bf16 %v576_v6  ;;  %v545_v19 = vunpack.c.h.bf16 %v576_v6  ;;  %v207_v20 = vmul.f32 %v536_v12, %v603_v1  ;;  %v208_v21 = vmul.f32 %v537_v13, %v603_v1 }
  0x3d   :  { %v209_v22 = vmul.f32 %v540_v14, %v603_v1  ;;  %v210_v23 = vmul.f32 %v541_v15, %v603_v1  ;;  %v276_v24 = vadd.f32 %v617_v7, %v205_v16  ;;  %v277_v25 = vadd.f32 %v617_v7, %v206_v17 }
  0x3e   :  { %v211_v26 = vmul.f32 %v544_v18, %v603_v1  ;;  %v212_v27 = vmul.f32 %v545_v19, %v603_v1  ;;  %v278_v28 = vadd.f32 %v617_v7, %v207_v20  ;;  %v279_v29 = vadd.f32 %v617_v7, %v208_v21 }
  0x3f   :  { %v280_v30 = vadd.f32 %v617_v7, %v209_v22  ;;  %v281_v31 = vadd.f32 %v617_v7, %v210_v23  ;;  %v340_v32 = vmax.f32 %v276_v24, 0.0  ;;  %v341_v33 = vmax.f32 %v277_v25, 0.0 }
  0x40   :  { %v282_v34 = vadd.f32 %v617_v7, %v211_v26  ;;  %v283_v35 = vadd.f32 %v617_v7, %v212_v27  ;;  %v342_v36 = vmax.f32 %v278_v28, 0.0  ;;  %v343_v37 = vmax.f32 %v279_v29, 0.0 }
  0x41   :  { %v344_v38 = vmax.f32 %v280_v30, 0.0  ;;  %v345_v39 = vmax.f32 %v281_v31, 0.0  ;;  %404 = vst [vmem:[%s1026_s3 + $0x1c0] sm:$0xff] %v340_v32  ;;  %405 = vst [vmem:[%s1026_s3 + $0x1c8] sm:$0xff] %v341_v33 }
  0x42   :  { %v346_v1 = vmax.f32 %v282_v34, 0.0  ;;  %v347_v40 = vmax.f32 %v283_v35, 0.0  ;;  %406 = vst [vmem:[%s1026_s3 + $0x1d0] sm:$0xff] %v342_v36  ;;  %407 = vst [vmem:[%s1026_s3 + $0x1d8] sm:$0xff] %v343_v37 }
  0x43   :  { %408 = vst [vmem:[%s1026_s3 + $0x1e0] sm:$0xff] %v344_v38  ;;  %409 = vst [vmem:[%s1026_s3 + $0x1e8] sm:$0xff] %v345_v39 }
  0x44   :  { %410 = vst [vmem:[%s1026_s3 + $0x1f0] sm:$0xff] %v346_v1  ;;  %411 = vst [vmem:[%s1026_s3 + $0x1f8] sm:$0xff] %v347_v40 }

// kernel: bn_conv2d.2
= control target key start
LH: loop header
LB: loop body
LE: loop exit
PB: predicated region body
PF: predicated region fallthrough
CT: control target
= control target key end

     0   :  { %v1705_v40 = vmov 0.0   ;;  %s2137_s1 = inlined_call_operand.vmem [shape: bf16[128,128], index: 1, kind: input, shape index: {}]   ;;  %s2138_s0 = inlined_call_operand.vmem [shape: bf16[512,128], index: 0, kind: input, shape index: {}]   ;;  %s2139_s2 = inlined_call_operand.vmem [shape: bf16[512,128], index: 2, kind: output, shape index: {0}]   ;;  %s2140_s3 = inlined_call_operand.vmem [shape: f32[8,128], index: 3, kind: output, shape index: {1}]  }
   0x1   :  { %v1665_v0 = vld [vmem:[%s2137_s1] sm:$0xff]   ;;  %v1666_v1 = vld [vmem:[%s2137_s1 + $0x8] sm:$0xff]   ;;  %v1667_v2 = vld [vmem:[%s2137_s1 + $0x10] sm:$0xff]   ;;  %18 = vst [vmem:[#allocation2] sm:$0xff] %v1705_v40 }
   0x2   :  { %1568 = vmatprep.subr.bf16.mxu0 %v1665_v0  ;;  %1648 = vmatprep.subr.bf16.mxu1 %v1665_v0  ;;  %v1668_v3 = vld [vmem:[%s2137_s1 + $0x18] sm:$0xff]   ;;  %v1673_v4 = vld [vmem:[%s2138_s0] sm:$0xff]   ;;  %v1670_v6 = vld [vmem:[%s2137_s1 + $0x28] sm:$0xff]  }
   0x3   :  { %1569 = vmatpush3.bf16.msra.mxu0 %v1665_v0  ;;  %1656 = vmatpush3.bf16.msra.mxu1 %v1665_v0  ;;  %v1669_v5 = vld [vmem:[%s2137_s1 + $0x20] sm:$0xff]   ;;  %v1671_v7 = vld [vmem:[%s2137_s1 + $0x30] sm:$0xff]   ;;  %v1672_v8 = vld [vmem:[%s2137_s1 + $0x38] sm:$0xff]  }
   0x4   :  { %1570 = vmatprep.subr.bf16.mxu0 %v1666_v1  ;;  %1649 = vmatprep.subr.bf16.mxu1 %v1666_v1  ;;  %v1689_v9 = vld [vmem:[%s2138_s0 + $0x80] sm:$0xff]   ;;  %v1674_v10 = vld [vmem:[%s2138_s0 + $0x8] sm:$0xff]   ;;  %v1675_v11 = vld [vmem:[%s2138_s0 + $0x10] sm:$0xff]  }
   0x5   :  { %1584 = vmatprep.mubr.bf16.mxu0 %v1673_v4  ;;  %1616 = vmatprep.mubr.bf16.mxu1 %v1689_v9  ;;  %v1690_v12 = vld [vmem:[%s2138_s0 + $0x88] sm:$0xff]   ;;  %v1691_v13 = vld [vmem:[%s2138_s0 + $0x90] sm:$0xff]   ;;  %v1676_v14 = vld [vmem:[%s2138_s0 + $0x18] sm:$0xff]  }
   0x6   :  { %v1677_v15 = vld [vmem:[%s2138_s0 + $0x20] sm:$0xff]   ;;  %v1692_v16 = vld [vmem:[%s2138_s0 + $0x98] sm:$0xff]   ;;  %v1678_v18 = vld [vmem:[%s2138_s0 + $0x28] sm:$0xff]  }
   0x7   :  { %1571 = vmatpush3.bf16.msra.mxu0 %v1666_v1  ;;  %1657 = vmatpush3.bf16.msra.mxu1 %v1666_v1  ;;  %v1693_v17 = vld [vmem:[%s2138_s0 + $0xa0] sm:$0xff]   ;;  %v1694_v19 = vld [vmem:[%s2138_s0 + $0xa8] sm:$0xff]   ;;  %v1679_v20 = vld [vmem:[%s2138_s0 + $0x30] sm:$0xff]  }
   0x8   :  { %1572 = vmatprep.subr.bf16.mxu0 %v1667_v2  ;;  %1650 = vmatprep.subr.bf16.mxu1 %v1667_v2  ;;  %v1695_v21 = vld [vmem:[%s2138_s0 + $0xb0] sm:$0xff]   ;;  %v1680_v22 = vld [vmem:[%s2138_s0 + $0x38] sm:$0xff]   ;;  %v1681_v24 = vld [vmem:[%s2138_s0 + $0x40] sm:$0xff]  }
   0x9   :  { %v1696_v23 = vld [vmem:[%s2138_s0 + $0xb8] sm:$0xff]   ;;  %v1697_v25 = vld [vmem:[%s2138_s0 + $0xc0] sm:$0xff]   ;;  %v1682_v26 = vld [vmem:[%s2138_s0 + $0x48] sm:$0xff]  }
   0xa   :  { %v1698_v27 = vld [vmem:[%s2138_s0 + $0xc8] sm:$0xff]   ;;  %v1683_v28 = vld [vmem:[%s2138_s0 + $0x50] sm:$0xff]   ;;  %v1684_v30 = vld [vmem:[%s2138_s0 + $0x58] sm:$0xff]  }
   0xb   :  { %1573 = vmatpush3.bf16.msra.mxu0 %v1667_v2  ;;  %1658 = vmatpush3.bf16.msra.mxu1 %v1667_v2  ;;  %v1699_v29 = vld [vmem:[%s2138_s0 + $0xd0] sm:$0xff]   ;;  %v1700_v31 = vld [vmem:[%s2138_s0 + $0xd8] sm:$0xff]   ;;  %v1685_v32 = vld [vmem:[%s2138_s0 + $0x60] sm:$0xff]  }
   0xc   :  { %1574 = vmatprep.subr.bf16.mxu0 %v1668_v3  ;;  %1651 = vmatprep.subr.bf16.mxu1 %v1668_v3  ;;  %v1701_v33 = vld [vmem:[%s2138_s0 + $0xe0] sm:$0xff]   ;;  %v1686_v34 = vld [vmem:[%s2138_s0 + $0x68] sm:$0xff]   ;;  %v1687_v36 = vld [vmem:[%s2138_s0 + $0x70] sm:$0xff]  }
   0xd   :  { %v1702_v35 = vld [vmem:[%s2138_s0 + $0xe8] sm:$0xff]   ;;  %v1703_v37 = vld [vmem:[%s2138_s0 + $0xf0] sm:$0xff]   ;;  %v1688_v38 = vld [vmem:[%s2138_s0 + $0x78] sm:$0xff]  }
   0xe   :  { %v1704_v39 = vld [vmem:[%s2138_s0 + $0xf8] sm:$0xff]  }
   0xf   :  { %1575 = vmatpush3.bf16.msra.mxu0 %v1668_v3  ;;  %1659 = vmatpush3.bf16.msra.mxu1 %v1668_v3 }
  0x10   :  { %1576 = vmatprep.subr.bf16.mxu0 %v1669_v5  ;;  %1652 = vmatprep.subr.bf16.mxu1 %v1669_v5 }
  0x13   :  { %1577 = vmatpush3.bf16.msra.mxu0 %v1669_v5  ;;  %1660 = vmatpush3.bf16.msra.mxu1 %v1669_v5 }
  0x14   :  { %1578 = vmatprep.subr.bf16.mxu0 %v1670_v6  ;;  %1653 = vmatprep.subr.bf16.mxu1 %v1670_v6 }
  0x17   :  { %1579 = vmatpush3.bf16.msra.mxu0 %v1670_v6  ;;  %1661 = vmatpush3.bf16.msra.mxu1 %v1670_v6 }
  0x18   :  { %1580 = vmatprep.subr.bf16.mxu0 %v1671_v7  ;;  %1654 = vmatprep.subr.bf16.mxu1 %v1671_v7 }
  0x1b   :  { %1581 = vmatpush3.bf16.msra.mxu0 %v1671_v7  ;;  %1662 = vmatpush3.bf16.msra.mxu1 %v1671_v7 }
  0x1c   :  { %1582 = vmatprep.subr.bf16.mxu0 %v1672_v8  ;;  %1655 = vmatprep.subr.bf16.mxu1 %v1672_v8 }
  0x1f   :  { %1583 = vmatpush3.bf16.msra.mxu0 %v1672_v8  ;;  %1663 = vmatpush3.bf16.msra.mxu1 %v1672_v8 }
  0x22   :  { %1585 = vmatmul.mubr.bf16.vlgmr.msra.gmra.mrb[0].mxu0 %v1674_v10  ;;  %1617 = vmatmul.mubr.bf16.vlgmr.msra.gmra.mrb[0].mxu1 %v1690_v12 }
  0x23   :  { %1588 = vmatprep.mubr.bf16.mxu0 %v1675_v11  ;;  %1620 = vmatprep.mubr.bf16.mxu1 %v1691_v13 }
  0x2a   :  { %1589 = vmatmul.mubr.bf16.gmra.mrb[4].mxu0 %v1676_v14  ;;  %1621 = vmatmul.mubr.bf16.gmra.mrb[4].mxu1 %v1692_v16 }
  0x2b   :  { %1592 = vmatprep.mubr.bf16.mxu0 %v1677_v15  ;;  %1624 = vmatprep.mubr.bf16.mxu1 %v1693_v17 }
  0x32   :  { %1593 = vmatmul.mubr.bf16.gmra.mrb[8].mxu0 %v1678_v18  ;;  %1625 = vmatmul.mubr.bf16.gmra.mrb[8].mxu1 %v1694_v19 }
  0x33   :  { %1596 = vmatprep.mubr.bf16.mxu0 %v1679_v20  ;;  %1628 = vmatprep.mubr.bf16.mxu1 %v1695_v21 }
  0x3a   :  { %1597 = vmatmul.mubr.bf16.gmra.mrb[12].mxu0 %v1680_v22  ;;  %1629 = vmatmul.mubr.bf16.gmra.mrb[12].mxu1 %v1696_v23 }
  0x3b   :  { %1600 = vmatprep.mubr.bf16.mxu0 %v1681_v24  ;;  %1632 = vmatprep.mubr.bf16.mxu1 %v1697_v25 }
  0x42   :  { %1601 = vmatmul.mubr.bf16.gmra.mrb[16].mxu0 %v1682_v26  ;;  %1633 = vmatmul.mubr.bf16.gmra.mrb[16].mxu1 %v1698_v27 }
  0x43   :  { %1604 = vmatprep.mubr.bf16.mxu0 %v1683_v28  ;;  %1636 = vmatprep.mubr.bf16.mxu1 %v1699_v29 }
  0x4a   :  { %1605 = vmatmul.mubr.bf16.gmra.mrb[20].mxu0 %v1684_v30  ;;  %1637 = vmatmul.mubr.bf16.gmra.mrb[20].mxu1 %v1700_v31 }
  0x4b   :  { %1608 = vmatprep.mubr.bf16.mxu0 %v1685_v32  ;;  %1640 = vmatprep.mubr.bf16.mxu1 %v1701_v33 }
  0x52   :  { %1609 = vmatmul.mubr.bf16.gmra.mrb[24].mxu0 %v1686_v34  ;;  %1641 = vmatmul.mubr.bf16.gmra.mrb[24].mxu1 %v1702_v35 }
  0x53   :  { %1612 = vmatprep.mubr.bf16.mxu0 %v1687_v36  ;;  %1644 = vmatprep.mubr.bf16.mxu1 %v1703_v37 }
  0x5a   :  { %1613 = vmatmul.mubr.bf16.gmra.mrb[28].mxu0 %v1688_v38  ;;  %1645 = vmatmul.mubr.bf16.gmra.mrb[28].mxu1 %v1704_v39 }
  0xf5   :  { %v1586_v41 = vpop.f32.mrb[0].mxu0  ;;  %v1846_v42 = vpop.f32.mrb[0].mxu1 }
  0xf6   :  { %v373_v43 = vpop.f32.mrb[1].mxu0  ;;  %v1848_v44 = vpop.f32.mrb[1].mxu1  ;;  %v1023_v56 = vmul.f32 %v1586_v41, %v1586_v41 }
  0xf7   :  { %v1587_v45 = vpop.f32.mrb[2].mxu0  ;;  %v1850_v46 = vpop.f32.mrb[2].mxu1  ;;  %v1021_v47 = vmul.f32 %v373_v43, %v373_v43 }
  0xf8   :  { %v1345_v48 = vpack.c.bf16 %v1587_v45, %v1586_v41  ;;  %v376_v49 = vpop.f32.mrb[3].mxu0  ;;  %v1425_v50 = vpack.c.bf16 %v1850_v46, %v1846_v42  ;;  %v1854_v51 = vpop.f32.mrb[3].mxu1  ;;  %v1024_v59 = vmul.f32 %v1587_v45, %v1587_v45 }
  0xf9   :  { %v1340_v52 = vpack.c.bf16 %v376_v49, %v373_v43  ;;  %v949_v53 = vadd.f32 %v376_v49, %v373_v43  ;;  %v1022_v54 = vmul.f32 %v376_v49, %v376_v49  ;;  %v1420_v55 = vpack.c.bf16 %v1854_v51, %v1848_v44 }
  0xfa   :  { %1497 = vst [vmem:[%s2139_s2 + $0x8] sm:$0xff] %v1345_v48   ;;  %1513 = vst [vmem:[%s2139_s2 + $0x88] sm:$0xff] %v1425_v50  }
  0xfb   :  { %1341 = vst [vmem:[%s2139_s2] sm:$0xff] %v1340_v52   ;;  %v950_v57 = vadd.f32 %v1586_v41, %v949_v53  ;;  %v1085_v58 = vadd.f32 %v1022_v54, %v1021_v47  ;;  %1512 = vst [vmem:[%s2139_s2 + $0x80] sm:$0xff] %v1420_v55  }
  0xfd   :  { %v1086_v60 = vadd.f32 %v1085_v58, %v1023_v56  ;;  %v1590_v61 = vpop.f32.mrb[4].mxu0  ;;  %v951_v62 = vadd.f32 %v1587_v45, %v950_v57  ;;  %v1870_v63 = vpop.f32.mrb[4].mxu1 }
  0xfe   :  { %v389_v0 = vpop.f32.mrb[5].mxu0  ;;  %v1872_v1 = vpop.f32.mrb[5].mxu1  ;;  %v1027_v16 = vmul.f32 %v1590_v61, %v1590_v61 }
  0xff   :  { %v952_v2 = vadd.f32 %v951_v62, %v389_v0  ;;  %v1025_v3 = vmul.f32 %v389_v0, %v389_v0  ;;  %v1087_v4 = vadd.f32 %v1086_v60, %v1024_v59  ;;  %v1591_v5 = vpop.f32.mrb[6].mxu0  ;;  %v1874_v6 = vpop.f32.mrb[6].mxu1 }
 0x100   :  { %v1355_v7 = vpack.c.bf16 %v1591_v5, %v1590_v61  ;;  %v392_v8 = vpop.f32.mrb[7].mxu0  ;;  %v1435_v9 = vpack.c.bf16 %v1874_v6, %v1870_v63  ;;  %v1878_v10 = vpop.f32.mrb[7].mxu1  ;;  %v1028_v19 = vmul.f32 %v1591_v5, %v1591_v5 }
 0x101   :  { %v1088_v11 = vadd.f32 %v1087_v4, %v1025_v3  ;;  %v1350_v12 = vpack.c.bf16 %v392_v8, %v389_v0  ;;  %v953_v13 = vadd.f32 %v952_v2, %v392_v8  ;;  %v1026_v14 = vmul.f32 %v392_v8, %v392_v8 }
 0x102   :  { %1499 = vst [vmem:[%s2139_s2 + $0x18] sm:$0xff] %v1355_v7   ;;  %1515 = vst [vmem:[%s2139_s2 + $0x98] sm:$0xff] %v1435_v9   ;;  %v1430_v15 = vpack.c.bf16 %v1878_v10, %v1872_v1 }
 0x103   :  { %1498 = vst [vmem:[%s2139_s2 + $0x10] sm:$0xff] %v1350_v12   ;;  %v954_v17 = vadd.f32 %v1590_v61, %v953_v13  ;;  %v1089_v18 = vadd.f32 %v1088_v11, %v1026_v14 }
 0x104   :  { %1514 = vst [vmem:[%s2139_s2 + $0x90] sm:$0xff] %v1430_v15  }
 0x105   :  { %v1090_v20 = vadd.f32 %v1089_v18, %v1027_v16  ;;  %v1594_v21 = vpop.f32.mrb[8].mxu0  ;;  %v955_v22 = vadd.f32 %v1591_v5, %v954_v17  ;;  %v1894_v23 = vpop.f32.mrb[8].mxu1 }
 0x106   :  { %v405_v24 = vpop.f32.mrb[9].mxu0  ;;  %v1896_v25 = vpop.f32.mrb[9].mxu1  ;;  %v1031_v40 = vmul.f32 %v1594_v21, %v1594_v21 }
 0x107   :  { %v956_v26 = vadd.f32 %v955_v22, %v405_v24  ;;  %v1029_v27 = vmul.f32 %v405_v24, %v405_v24  ;;  %v1091_v28 = vadd.f32 %v1090_v20, %v1028_v19  ;;  %v1595_v29 = vpop.f32.mrb[10].mxu0  ;;  %v1898_v30 = vpop.f32.mrb[10].mxu1 }
 0x108   :  { %v1365_v31 = vpack.c.bf16 %v1595_v29, %v1594_v21  ;;  %v408_v32 = vpop.f32.mrb[11].mxu0  ;;  %v1445_v33 = vpack.c.bf16 %v1898_v30, %v1894_v23  ;;  %v1902_v34 = vpop.f32.mrb[11].mxu1  ;;  %v1032_v45 = vmul.f32 %v1595_v29, %v1595_v29 }
 0x109   :  { %v1092_v35 = vadd.f32 %v1091_v28, %v1029_v27  ;;  %v1360_v36 = vpack.c.bf16 %v408_v32, %v405_v24  ;;  %v957_v37 = vadd.f32 %v956_v26, %v408_v32  ;;  %v1030_v38 = vmul.f32 %v408_v32, %v408_v32 }
 0x10a   :  { %1501 = vst [vmem:[%s2139_s2 + $0x28] sm:$0xff] %v1365_v31   ;;  %1517 = vst [vmem:[%s2139_s2 + $0xa8] sm:$0xff] %v1445_v33   ;;  %v1440_v39 = vpack.c.bf16 %v1902_v34, %v1896_v25 }
 0x10b   :  { %1500 = vst [vmem:[%s2139_s2 + $0x20] sm:$0xff] %v1360_v36   ;;  %v958_v41 = vadd.f32 %v1594_v21, %v957_v37  ;;  %v1093_v43 = vadd.f32 %v1092_v35, %v1030_v38 }
 0x10c   :  { %1516 = vst [vmem:[%s2139_s2 + $0xa0] sm:$0xff] %v1440_v39  }
 0x10d   :  { %v1094_v47 = vadd.f32 %v1093_v43, %v1031_v40  ;;  %v1598_v48 = vpop.f32.mrb[12].mxu0  ;;  %v959_v49 = vadd.f32 %v1595_v29, %v958_v41  ;;  %v1918_v50 = vpop.f32.mrb[12].mxu1 }
 0x10e   :  { %v421_v52 = vpop.f32.mrb[13].mxu0  ;;  %v1920_v53 = vpop.f32.mrb[13].mxu1  ;;  %v1035_v7 = vmul.f32 %v1598_v48, %v1598_v48 }
 0x10f   :  { %v960_v54 = vadd.f32 %v959_v49, %v421_v52  ;;  %v1033_v55 = vmul.f32 %v421_v52, %v421_v52  ;;  %v1095_v56 = vadd.f32 %v1094_v47, %v1032_v45  ;;  %v1599_v57 = vpop.f32.mrb[14].mxu0  ;;  %v1922_v58 = vpop.f32.mrb[14].mxu1 }
 0x110   :  { %v1375_v59 = vpack.c.bf16 %v1599_v57, %v1598_v48  ;;  %v424_v60 = vpop.f32.mrb[15].mxu0  ;;  %v1455_v61 = vpack.c.bf16 %v1922_v58, %v1918_v50  ;;  %v1926_v62 = vpop.f32.mrb[15].mxu1  ;;  %v1036_v11 = vmul.f32 %v1599_v57, %v1599_v57 }
 0x111   :  { %v1096_v0 = vadd.f32 %v1095_v56, %v1033_v55  ;;  %v1370_v2 = vpack.c.bf16 %v424_v60, %v421_v52  ;;  %v961_v3 = vadd.f32 %v960_v54, %v424_v60  ;;  %v1034_v4 = vmul.f32 %v424_v60, %v424_v60 }
 0x112   :  { %1503 = vst [vmem:[%s2139_s2 + $0x38] sm:$0xff] %v1375_v59   ;;  %1519 = vst [vmem:[%s2139_s2 + $0xb8] sm:$0xff] %v1455_v61   ;;  %v1450_v5 = vpack.c.bf16 %v1926_v62, %v1920_v53 }
 0x113   :  { %1502 = vst [vmem:[%s2139_s2 + $0x30] sm:$0xff] %v1370_v2   ;;  %v962_v8 = vadd.f32 %v1598_v48, %v961_v3  ;;  %v1097_v9 = vadd.f32 %v1096_v0, %v1034_v4 }
 0x114   :  { %1518 = vst [vmem:[%s2139_s2 + $0xb0] sm:$0xff] %v1450_v5  }
 0x115   :  { %v1098_v12 = vadd.f32 %v1097_v9, %v1035_v7  ;;  %v1602_v13 = vpop.f32.mrb[16].mxu0  ;;  %v963_v14 = vadd.f32 %v1599_v57, %v962_v8  ;;  %v1942_v15 = vpop.f32.mrb[16].mxu1 }
 0x116   :  { %v437_v16 = vpop.f32.mrb[17].mxu0  ;;  %v1944_v17 = vpop.f32.mrb[17].mxu1  ;;  %v1039_v36 = vmul.f32 %v1602_v13, %v1602_v13 }
 0x117   :  { %v964_v18 = vadd.f32 %v963_v14, %v437_v16  ;;  %v1037_v19 = vmul.f32 %v437_v16, %v437_v16  ;;  %v1099_v20 = vadd.f32 %v1098_v12, %v1036_v11  ;;  %v1603_v21 = vpop.f32.mrb[18].mxu0  ;;  %v1946_v22 = vpop.f32.mrb[18].mxu1 }
 0x118   :  { %v1385_v24 = vpack.c.bf16 %v1603_v21, %v1602_v13  ;;  %v440_v26 = vpop.f32.mrb[19].mxu0  ;;  %v1465_v27 = vpack.c.bf16 %v1946_v22, %v1942_v15  ;;  %v1950_v28 = vpop.f32.mrb[19].mxu1  ;;  %v1040_v39 = vmul.f32 %v1603_v21, %v1603_v21 }
 0x119   :  { %v1100_v29 = vadd.f32 %v1099_v20, %v1037_v19  ;;  %v1380_v31 = vpack.c.bf16 %v440_v26, %v437_v16  ;;  %v965_v32 = vadd.f32 %v964_v18, %v440_v26  ;;  %v1038_v33 = vmul.f32 %v440_v26, %v440_v26 }
 0x11a   :  { %1505 = vst [vmem:[%s2139_s2 + $0x48] sm:$0xff] %v1385_v24   ;;  %1521 = vst [vmem:[%s2139_s2 + $0xc8] sm:$0xff] %v1465_v27   ;;  %v1460_v35 = vpack.c.bf16 %v1950_v28, %v1944_v17 }
 0x11b   :  { %1504 = vst [vmem:[%s2139_s2 + $0x40] sm:$0xff] %v1380_v31   ;;  %v966_v37 = vadd.f32 %v1602_v13, %v965_v32  ;;  %v1101_v38 = vadd.f32 %v1100_v29, %v1038_v33 }
 0x11c   :  { %1520 = vst [vmem:[%s2139_s2 + $0xc0] sm:$0xff] %v1460_v35  }
 0x11d   :  { %v1102_v40 = vadd.f32 %v1101_v38, %v1039_v36  ;;  %v1606_v41 = vpop.f32.mrb[20].mxu0  ;;  %v967_v43 = vadd.f32 %v1603_v21, %v966_v37  ;;  %v1966_v45 = vpop.f32.mrb[20].mxu1 }
 0x11e   :  { %v453_v47 = vpop.f32.mrb[21].mxu0  ;;  %v1968_v48 = vpop.f32.mrb[21].mxu1  ;;  %v1043_v7 = vmul.f32 %v1606_v41, %v1606_v41 }
 0x11f   :  { %v968_v49 = vadd.f32 %v967_v43, %v453_v47  ;;  %v1041_v52 = vmul.f32 %v453_v47, %v453_v47  ;;  %v1103_v54 = vadd.f32 %v1102_v40, %v1040_v39  ;;  %v1607_v55 = vpop.f32.mrb[22].mxu0  ;;  %v1970_v56 = vpop.f32.mrb[22].mxu1 }
 0x120   :  { %v1395_v57 = vpack.c.bf16 %v1607_v55, %v1606_v41  ;;  %v456_v59 = vpop.f32.mrb[23].mxu0  ;;  %v1475_v60 = vpack.c.bf16 %v1970_v56, %v1966_v45  ;;  %v1974_v61 = vpop.f32.mrb[23].mxu1  ;;  %v1044_v11 = vmul.f32 %v1607_v55, %v1607_v55 }
 0x121   :  { %v1104_v0 = vadd.f32 %v1103_v54, %v1041_v52  ;;  %v1390_v2 = vpack.c.bf16 %v456_v59, %v453_v47  ;;  %v969_v3 = vadd.f32 %v968_v49, %v456_v59  ;;  %v1042_v4 = vmul.f32 %v456_v59, %v456_v59 }
 0x122   :  { %1507 = vst [vmem:[%s2139_s2 + $0x58] sm:$0xff] %v1395_v57   ;;  %1523 = vst [vmem:[%s2139_s2 + $0xd8] sm:$0xff] %v1475_v60   ;;  %v1470_v5 = vpack.c.bf16 %v1974_v61, %v1968_v48 }
 0x123   :  { %1506 = vst [vmem:[%s2139_s2 + $0x50] sm:$0xff] %v1390_v2   ;;  %v970_v8 = vadd.f32 %v1606_v41, %v969_v3  ;;  %v1105_v9 = vadd.f32 %v1104_v0, %v1042_v4 }
 0x124   :  { %1522 = vst [vmem:[%s2139_s2 + $0xd0] sm:$0xff] %v1470_v5  }
 0x125   :  { %v1106_v12 = vadd.f32 %v1105_v9, %v1043_v7  ;;  %v1610_v13 = vpop.f32.mrb[24].mxu0  ;;  %v971_v14 = vadd.f32 %v1607_v55, %v970_v8  ;;  %v1990_v16 = vpop.f32.mrb[24].mxu1 }
 0x126   :  { %v469_v18 = vpop.f32.mrb[25].mxu0  ;;  %v1992_v19 = vpop.f32.mrb[25].mxu1  ;;  %v1047_v40 = vmul.f32 %v1610_v13, %v1610_v13 }
 0x127   :  { %v972_v20 = vadd.f32 %v971_v14, %v469_v18  ;;  %v1045_v21 = vmul.f32 %v469_v18, %v469_v18  ;;  %v1107_v24 = vadd.f32 %v1106_v12, %v1044_v11  ;;  %v1611_v26 = vpop.f32.mrb[26].mxu0  ;;  %v1994_v27 = vpop.f32.mrb[26].mxu1 }
 0x128   :  { %v1405_v29 = vpack.c.bf16 %v1611_v26, %v1610_v13  ;;  %v472_v31 = vpop.f32.mrb[27].mxu0  ;;  %v1485_v32 = vpack.c.bf16 %v1994_v27, %v1990_v16  ;;  %v1998_v33 = vpop.f32.mrb[27].mxu1  ;;  %v1048_v47 = vmul.f32 %v1611_v26, %v1611_v26 }
 0x129   :  { %v1108_v35 = vadd.f32 %v1107_v24, %v1045_v21  ;;  %v1400_v36 = vpack.c.bf16 %v472_v31, %v469_v18  ;;  %v973_v37 = vadd.f32 %v972_v20, %v472_v31  ;;  %v1046_v38 = vmul.f32 %v472_v31, %v472_v31 }
 0x12a   :  { %1509 = vst [vmem:[%s2139_s2 + $0x68] sm:$0xff] %v1405_v29   ;;  %1525 = vst [vmem:[%s2139_s2 + $0xe8] sm:$0xff] %v1485_v32   ;;  %v1480_v39 = vpack.c.bf16 %v1998_v33, %v1992_v19  ;;  %v1053_v32 = vmul.f32 %v1848_v44, %v1848_v44 }
 0x12b   :  { %1508 = vst [vmem:[%s2139_s2 + $0x60] sm:$0xff] %v1400_v36   ;;  %v974_v41 = vadd.f32 %v1610_v13, %v973_v37  ;;  %v1109_v43 = vadd.f32 %v1108_v35, %v1046_v38 }
 0x12c   :  { %1524 = vst [vmem:[%s2139_s2 + $0xe0] sm:$0xff] %v1480_v39   ;;  %v1054_v39 = vmul.f32 %v1854_v51, %v1854_v51 }
 0x12d   :  { %v1110_v49 = vadd.f32 %v1109_v43, %v1047_v40  ;;  %v1614_v52 = vpop.f32.mrb[28].mxu0  ;;  %v975_v54 = vadd.f32 %v1611_v26, %v974_v41  ;;  %v2014_v55 = vpop.f32.mrb[28].mxu1  ;;  %v1055_v40 = vmul.f32 %v1846_v42, %v1846_v42 }
 0x12e   :  { %v485_v57 = vpop.f32.mrb[29].mxu0  ;;  %v2016_v59 = vpop.f32.mrb[29].mxu1  ;;  %v1051_v20 = vmul.f32 %v1614_v52, %v1614_v52 }
 0x12f   :  { %v976_v60 = vadd.f32 %v975_v54, %v485_v57  ;;  %v1049_v0 = vmul.f32 %v485_v57, %v485_v57  ;;  %v1111_v2 = vadd.f32 %v1110_v49, %v1048_v47  ;;  %v1615_v3 = vpop.f32.mrb[30].mxu0  ;;  %v2018_v4 = vpop.f32.mrb[30].mxu1  ;;  %v1056_v47 = vmul.f32 %v1850_v46, %v1850_v46 }
 0x130   :  { %v1415_v5 = vpack.c.bf16 %v1615_v3, %v1614_v52  ;;  %v488_v7 = vpop.f32.mrb[31].mxu0  ;;  %v1495_v8 = vpack.c.bf16 %v2018_v4, %v2014_v55  ;;  %v2022_v9 = vpop.f32.mrb[31].mxu1  ;;  %v1052_v26 = vmul.f32 %v1615_v3, %v1615_v3 }
 0x131   :  { %v1112_v11 = vadd.f32 %v1111_v2, %v1049_v0  ;;  %v1410_v12 = vpack.c.bf16 %v488_v7, %v485_v57  ;;  %v977_v13 = vadd.f32 %v976_v60, %v488_v7  ;;  %v1050_v14 = vmul.f32 %v488_v7, %v488_v7 }
 0x132   :  { %1511 = vst [vmem:[%s2139_s2 + $0x78] sm:$0xff] %v1415_v5   ;;  %1527 = vst [vmem:[%s2139_s2 + $0xf8] sm:$0xff] %v1495_v8   ;;  %v1490_v18 = vpack.c.bf16 %v2022_v9, %v2016_v59  ;;  %v1058_v0 = vmul.f32 %v1878_v10, %v1878_v10 }
 0x133   :  { %1510 = vst [vmem:[%s2139_s2 + $0x70] sm:$0xff] %v1410_v12   ;;  %v978_v21 = vadd.f32 %v1614_v52, %v977_v13  ;;  %v1113_v24 = vadd.f32 %v1112_v11, %v1050_v14  ;;  %v1062_v13 = vmul.f32 %v1902_v34, %v1902_v34 }
 0x134   :  { %1526 = vst [vmem:[%s2139_s2 + $0xf0] sm:$0xff] %v1490_v18  }
 0x135   :  { %v1114_v29 = vadd.f32 %v1113_v24, %v1051_v20  ;;  %v979_v31 = vadd.f32 %v1615_v3, %v978_v21 }
 0x137   :  { %v980_v35 = vadd.f32 %v979_v31, %v1848_v44  ;;  %v1115_v36 = vadd.f32 %v1114_v29, %v1052_v26  ;;  %v1057_v44 = vmul.f32 %v1872_v1, %v1872_v1  ;;  %v1066_v31 = vmul.f32 %v1926_v62, %v1926_v62 }
 0x139   :  { %v1116_v37 = vadd.f32 %v1115_v36, %v1053_v32  ;;  %v981_v38 = vadd.f32 %v980_v35, %v1854_v51 }
 0x13b   :  { %v982_v41 = vadd.f32 %v1846_v42, %v981_v38  ;;  %v1117_v43 = vadd.f32 %v1116_v37, %v1054_v39  ;;  %v1059_v42 = vmul.f32 %v1870_v63, %v1870_v63 }
 0x13d   :  { %v1118_v49 = vadd.f32 %v1117_v43, %v1055_v40  ;;  %v983_v52 = vadd.f32 %v1850_v46, %v982_v41  ;;  %v1060_v46 = vmul.f32 %v1874_v6, %v1874_v6  ;;  %v1070_v41 = vmul.f32 %v1950_v28, %v1950_v28 }
 0x13f   :  { %v984_v54 = vadd.f32 %v983_v52, %v1872_v1  ;;  %v1119_v57 = vadd.f32 %v1118_v49, %v1056_v47  ;;  %v1061_v1 = vmul.f32 %v1896_v25, %v1896_v25 }
 0x141   :  { %v1120_v60 = vadd.f32 %v1119_v57, %v1057_v44  ;;  %v985_v51 = vadd.f32 %v984_v54, %v1878_v10 }
 0x143   :  { %v986_v2 = vadd.f32 %v1870_v63, %v985_v51  ;;  %v1121_v3 = vadd.f32 %v1120_v60, %v1058_v0  ;;  %v1063_v63 = vmul.f32 %v1894_v23, %v1894_v23  ;;  %v1074_v60 = vmul.f32 %v1974_v61, %v1974_v61 }
 0x145   :  { %v1122_v5 = vadd.f32 %v1121_v3, %v1059_v42  ;;  %v987_v7 = vadd.f32 %v1874_v6, %v986_v2  ;;  %v1064_v6 = vmul.f32 %v1898_v30, %v1898_v30 }
 0x147   :  { %v988_v8 = vadd.f32 %v987_v7, %v1896_v25  ;;  %v1123_v11 = vadd.f32 %v1122_v5, %v1060_v46  ;;  %v1065_v25 = vmul.f32 %v1920_v53, %v1920_v53  ;;  %v1078_v7 = vmul.f32 %v1998_v33, %v1998_v33 }
 0x149   :  { %v1124_v12 = vadd.f32 %v1123_v11, %v1061_v1  ;;  %v989_v10 = vadd.f32 %v988_v8, %v1902_v34 }
 0x14b   :  { %v990_v14 = vadd.f32 %v1894_v23, %v989_v10  ;;  %v1125_v18 = vadd.f32 %v1124_v12, %v1062_v13  ;;  %v1067_v23 = vmul.f32 %v1918_v50, %v1918_v50 }
 0x14d   :  { %v1126_v20 = vadd.f32 %v1125_v18, %v1063_v63  ;;  %v991_v21 = vadd.f32 %v1898_v30, %v990_v14  ;;  %v1068_v30 = vmul.f32 %v1922_v58, %v1922_v58  ;;  %v1082_v14 = vmul.f32 %v2022_v9, %v2022_v9 }
 0x14f   :  { %v992_v24 = vadd.f32 %v991_v21, %v1920_v53  ;;  %v1127_v26 = vadd.f32 %v1126_v20, %v1064_v6  ;;  %v1069_v53 = vmul.f32 %v1944_v17, %v1944_v17 }
 0x151   :  { %v1128_v29 = vadd.f32 %v1127_v26, %v1065_v25  ;;  %v993_v34 = vadd.f32 %v992_v24, %v1926_v62 }
 0x153   :  { %v994_v32 = vadd.f32 %v1918_v50, %v993_v34  ;;  %v1129_v35 = vadd.f32 %v1128_v29, %v1066_v31  ;;  %v1071_v50 = vmul.f32 %v1942_v15, %v1942_v15 }
 0x155   :  { %v1130_v36 = vadd.f32 %v1129_v35, %v1067_v23  ;;  %v995_v37 = vadd.f32 %v1922_v58, %v994_v32  ;;  %v1072_v58 = vmul.f32 %v1946_v22, %v1946_v22  ;;  %v948_v35 = vld [vmem:[#allocation2] sm:$0x1] }
 0x157   :  { %v996_v38 = vadd.f32 %v995_v37, %v1944_v17  ;;  %v1131_v39 = vadd.f32 %v1130_v36, %v1068_v30  ;;  %v1073_v17 = vmul.f32 %v1968_v48, %v1968_v48  ;;  %v1020_v36 = vld [vmem:[#allocation2 + $0x1] sm:$0x1] }
 0x159   :  { %v1132_v40 = vadd.f32 %v1131_v39, %v1069_v53  ;;  %v997_v62 = vadd.f32 %v996_v38, %v1950_v28 }
 0x15b   :  { %v998_v43 = vadd.f32 %v1942_v15, %v997_v62  ;;  %v1133_v47 = vadd.f32 %v1132_v40, %v1070_v41  ;;  %v1075_v15 = vmul.f32 %v1966_v45, %v1966_v45 }
 0x15d   :  { %v1134_v49 = vadd.f32 %v1133_v47, %v1071_v50  ;;  %v999_v52 = vadd.f32 %v1946_v22, %v998_v43  ;;  %v1076_v22 = vmul.f32 %v1970_v56, %v1970_v56 }
 0x15f   :  { %v1000_v44 = vadd.f32 %v999_v52, %v1968_v48  ;;  %v1135_v54 = vadd.f32 %v1134_v49, %v1072_v58  ;;  %v1077_v48 = vmul.f32 %v1992_v19, %v1992_v19 }
 0x161   :  { %v1136_v57 = vadd.f32 %v1135_v54, %v1073_v17  ;;  %v1001_v28 = vadd.f32 %v1000_v44, %v1974_v61 }
 0x163   :  { %v1002_v51 = vadd.f32 %v1966_v45, %v1001_v28  ;;  %v1137_v0 = vadd.f32 %v1136_v57, %v1074_v60  ;;  %v1079_v45 = vmul.f32 %v1990_v16, %v1990_v16 }
 0x165   :  { %v1138_v42 = vadd.f32 %v1137_v0, %v1075_v15  ;;  %v1003_v2 = vadd.f32 %v1970_v56, %v1002_v51  ;;  %v1080_v56 = vmul.f32 %v1994_v27, %v1994_v27 }
 0x167   :  { %v1004_v3 = vadd.f32 %v1003_v2, %v1992_v19  ;;  %v1139_v46 = vadd.f32 %v1138_v42, %v1076_v22  ;;  %v1081_v19 = vmul.f32 %v2016_v59, %v2016_v59 }
 0x169   :  { %v1140_v5 = vadd.f32 %v1139_v46, %v1077_v48  ;;  %v1005_v61 = vadd.f32 %v1004_v3, %v1998_v33 }
 0x16b   :  { %v1006_v1 = vadd.f32 %v1990_v16, %v1005_v61  ;;  %v1141_v8 = vadd.f32 %v1140_v5, %v1078_v7  ;;  %v1083_v16 = vmul.f32 %v2014_v55, %v2014_v55 }
 0x16d   :  { %v1142_v11 = vadd.f32 %v1141_v8, %v1079_v45  ;;  %v1007_v12 = vadd.f32 %v1994_v27, %v1006_v1  ;;  %v1084_v27 = vmul.f32 %v2018_v4, %v2018_v4 }
 0x16f   :  { %v1008_v10 = vadd.f32 %v1007_v12, %v2016_v59  ;;  %v1143_v13 = vadd.f32 %v1142_v11, %v1080_v56 }
 0x171   :  { %v1144_v63 = vadd.f32 %v1143_v13, %v1081_v19  ;;  %v1009_v33 = vadd.f32 %v1008_v10, %v2022_v9 }
 0x173   :  { %v1010_v18 = vadd.f32 %v2014_v55, %v1009_v33  ;;  %v1145_v6 = vadd.f32 %v1144_v63, %v1082_v14 }
 0x175   :  { %v1011_v20 = vadd.f32 %v2018_v4, %v1010_v18  ;;  %v1146_v21 = vadd.f32 %v1145_v6, %v1083_v16 }
 0x177   :  { %v1012_v59 = vrot.slane %v1011_v20, 4  ;;  %v1147_v25 = vadd.f32 %v1146_v21, %v1084_v27 }
 0x179   :  { %v1013_v24 = vadd.f32 %v1012_v59, %v1011_v20  ;;  %v1148_v26 = vrot.slane %v1147_v25, 4 }
 0x17b   :  { %v1014_v29 = vrot.slane %v1013_v24, 2  ;;  %v1149_v34 = vadd.f32 %v1148_v26, %v1147_v25 }
 0x17d   :  { %v1015_v31 = vadd.f32 %v1014_v29, %v1013_v24  ;;  %v1150_v9 = vrot.slane %v1149_v34, 2 }
 0x17f   :  { %v1016_v23 = vrot.slane %v1015_v31, 1  ;;  %v1151_v32 = vadd.f32 %v1150_v9, %v1149_v34 }
 0x181   :  { %v1017_v30 = vadd.f32 %v1016_v23, %v1015_v31  ;;  %v1152_v55 = vrot.slane %v1151_v32, 1 }
 0x183   :  { %v1018_v37 = vadd.f32 %v1017_v30, %v948_v35  ;;  %v1153_v53 = vadd.f32 %v1152_v55, %v1151_v32 }
 0x185   :  { %1019 = vst [vmem:[#allocation2] sm:$0x1] %v1018_v37  ;;  %v1154_v38 = vadd.f32 %v1153_v53, %v1020_v36 }
 0x187   :  { %1155 = vst [vmem:[#allocation2 + $0x1] sm:$0x1] %v1154_v38 }
 0x18e   :  { %v1159_v4 = vld [vmem:[#allocation2] sm:$0xff] }
 0x18f   :  { %1160 = vst [vmem:[%s2140_s3] sm:$0xff] %v1159_v4 }

</bundles_post_ra>
